<compile_context>
chip_gen: v6e
topology: v6e:2x2x1
jax: 0.10.0
libtpu: 0.0.40
codegen_flags: <defaults>
</compile_context>

<pallas_src>
import functools

import jax
import jax.numpy as jnp
from jax import lax
from jax.experimental import pallas as pl
from jax.experimental.pallas import tpu as pltpu

_NEG_BIG = -1e30  # large negative instead of -inf (exp underflows to exactly 0)

_TARGET_BLOCK_BYTES = 3 * 1024 * 1024      # ~3 MiB x-blocks (review: 1-4 MiB)
_VMEM_LIMIT_BYTES = 48 * 1024 * 1024       # explicit scoped VMEM limit (v7x-safe)
_VMEM_WORK_FRACTION = 0.75                 # headroom under the scoped limit


def _block_diag(blocks):
    rows = sum(b.shape[0] for b in blocks)
    cols = sum(b.shape[1] for b in blocks)
    out = jnp.zeros((rows, cols), blocks[0].dtype)
    r = c = 0
    for b in blocks:
        out = out.at[r:r + b.shape[0], c:c + b.shape[1]].set(b)
        r += b.shape[0]
        c += b.shape[1]
    return out


# --------------------------------------------------------------------------
# Fused single-pass kernel: stats + modulation + apply, whole N resident.
# --------------------------------------------------------------------------
def _acm3d_fused_kernel(x_ref, wkq_ref, ssel_ref, w1_ref, b1_ref, w2_ref, b2_ref,
                        y_ref, *, rows, n_inv):
    @pl.loop(0, rows)                        # fold `rows` batch rows per grid step
    def _row(i):
        x = x_ref[i].astype(jnp.float32)                                     # (C, N)
        # Fused K/Q logits.  Conv bias and the (W @ mu) shift are per-row
        # constants and softmax is shift-invariant -> dropped exactly.
        logits = jnp.dot(wkq_ref[...], x,
                         preferred_element_type=jnp.float32)                 # (2H, N)
        m = jnp.max(logits, axis=1, keepdims=True)                           # (2H, 1)
        p = jnp.exp(logits - m)                                              # (2H, N)
        l = jnp.sum(p, axis=1, keepdims=True)                                # (2H, 1)
        r = jnp.einsum('cn,hn->ch', x, p,
                       preferred_element_type=jnp.float32)                   # (C, 2H)
        inv_l = pl.reciprocal(l, approx=False)
        # K - Q per channel (the mu offset of the value side cancels exactly).
        kq = jnp.dot(r * ssel_ref[...], inv_l,
                     preferred_element_type=jnp.float32)                     # (C, 1)
        # ModulateModule on the channel mean.
        mu = jnp.sum(x, axis=1, keepdims=True) * n_inv                       # (C, 1)
        h1 = jnp.maximum(
            jnp.dot(w1_ref[...], mu, preferred_element_type=jnp.float32)
            + b1_ref[...], 0.0)
        pmod = jax.nn.sigmoid(
            jnp.dot(w2_ref[...], h1, preferred_element_type=jnp.float32)
            + b2_ref[...])                                                   # (C, 1)
        y_ref[i] = ((x + kq) * pmod).astype(y_ref.dtype)


# --------------------------------------------------------------------------
# Two-pass fallback: pass 1 = online-softmax partial stats over spatial tiles.
# --------------------------------------------------------------------------
def _acm3d_stats_kernel(x_ref, wkq_ref,
                        m_out, l_out, r_out, xs_out,
                        m_sc, l_sc, r_sc, xs_sc,
                        *, n_true, tile_n, tiles_per_split, needs_mask):
    s_idx = pl.program_id(1)
    n_idx = pl.program_id(2)
    two_heads = wkq_ref.shape[0]

    @pl.when(n_idx == 0)
    def _init():
        m_sc[...] = jnp.full_like(m_sc, _NEG_BIG)
        l_sc[...] = jnp.zeros_like(l_sc)
        r_sc[...] = jnp.zeros_like(r_sc)
        xs_sc[...] = jnp.zeros_like(xs_sc)

    x = x_ref[0].astype(jnp.float32)                                         # (C, TN)

    if needs_mask:
        # `valid` >= tile_n on full tiles, so the select is a no-op there;
        # <= 0 on fully-OOB (clamped) tiles, masking them out entirely.
        global_tile = s_idx * tiles_per_split + n_idx
        valid = n_true - global_tile * tile_n
        lane = lax.broadcasted_iota(jnp.int32, (1, tile_n), 1)
        keep = lane < valid
        x = jnp.where(keep, x, 0.0)

    logits = jnp.dot(wkq_ref[...], x, preferred_element_type=jnp.float32)    # (2H, TN)
    if needs_mask:
        logits = jnp.where(keep, logits, _NEG_BIG)

    # ---- online softmax update (each of the 2H rows is an independent softmax) ----
    m_old = m_sc[...]
    m_new = jnp.maximum(m_old, jnp.max(logits, axis=1, keepdims=True))       # (2H, 1)
    alpha = jnp.exp(m_old - m_new)
    p = jnp.exp(logits - m_new)                                              # (2H, TN)

    l_sc[...] = alpha * l_sc[...] + jnp.sum(p, axis=1, keepdims=True)
    m_sc[...] = m_new

    # Column-wise rescale of the (C, 2H) accumulator by alpha via diag matmul
    # (keeps natural layouts, no cross-lane relayout).
    row = lax.broadcasted_iota(jnp.int32, (two_heads, two_heads), 0)
    col = lax.broadcasted_iota(jnp.int32, (two_heads, two_heads), 1)
    diag_alpha = jnp.where(row == col, alpha, 0.0)                           # (2H, 2H)

    r_upd = jnp.einsum('cn,hn->ch', x, p,
                       preferred_element_type=jnp.float32)                   # (C, 2H)
    r_sc[...] = jnp.dot(r_sc[...], diag_alpha,
                        preferred_element_type=jnp.float32) + r_upd

    xs_sc[...] = xs_sc[...] + jnp.sum(x, axis=1, keepdims=True)              # (C, 1)

    @pl.when(n_idx == pl.num_programs(2) - 1)
    def _finalize():
        m_out[0, 0] = m_sc[...]
        l_out[0, 0] = l_sc[...]
        r_out[0, 0] = r_sc[...]
        xs_out[0, 0] = xs_sc[...]


def _acm3d_apply_kernel(x_ref, scale_ref, shift_ref, y_ref):
    """Pass 2: y = (x + K - Q) * P  ==  x * scale + shift, per spatial tile."""
    x = x_ref[0].astype(jnp.float32)                                         # (C, TN)
    y_ref[0] = (x * scale_ref[0] + shift_ref[0]).astype(y_ref.dtype)


# --------------------------------------------------------------------------
# Wrapper
# --------------------------------------------------------------------------
def acm3d_forward(x, params, num_heads, *,
                  block_target_bytes=_TARGET_BLOCK_BYTES,
                  vmem_limit_bytes=_VMEM_LIMIT_BYTES,
                  force_two_pass=False,
                  tile_n=None):
    B, C, H, W, Z = x.shape
    heads = int(num_heads)
    N = H * W * Z
    cph = C // heads
    cmid = C // 2
    cout1_g = cmid // heads
    two_h = 2 * heads
    esize = jnp.dtype(x.dtype).itemsize
    work = int(vmem_limit_bytes * _VMEM_WORK_FRACTION)

    # ---- dense equivalents of the grouped 1x1x1 convolutions ----
    head_idx = jnp.arange(C) // cph
    S = jax.nn.one_hot(head_idx, heads, dtype=jnp.float32)                   # (C, H)
    WK = S.T * params["wk"].reshape(C)[None, :]                              # (H, C)
    WQ = S.T * params["wq"].reshape(C)[None, :]
    WKQ = jnp.concatenate([WK, WQ], axis=0)                                  # (2H, C)
    Ssel = jnp.concatenate([S, -S], axis=1)                                  # (C, 2H)
    W1 = _block_diag([params["w1"][g * cout1_g:(g + 1) * cout1_g]
                      for g in range(heads)])                                # (Cmid, C)
    W2 = _block_diag([params["w2"][g * cph:(g + 1) * cph]
                      for g in range(heads)])                                # (C, Cmid)
    b1v = params["b1"].astype(jnp.float32)
    b2v = params["b2"].astype(jnp.float32)

    x_flat = x.reshape(B, C, N)   # free reshape, no pad / no extra HBM pass

    # ---------------- fused single-pass path ----------------
    def fused_step_bytes(bb):
        blocks = 4 * bb * C * N * esize                     # in + out, double-buffered
        temps = (2 * C + 2 * two_h) * N * 4                 # f32 x/y + logits + p (1 row)
        weights = 2 * 4 * (two_h * C + C * two_h + cmid * C + C * cmid + cmid + C)
        return blocks + temps + weights

    use_fused = (not force_two_pass) and fused_step_bytes(1) <= work

    if use_fused:
        bb = max(1, min(8, block_target_bytes // max(1, C * N * esize)))
        if B > 1:
            bb = max(1, min(bb, B // 2))        # keep >= 2 grid steps for megacore
        bb = min(bb, B)
        while bb > 1 and fused_step_bytes(bb) > work:
            bb -= 1
        while B % bb:                           # exact batch coverage
            bb -= 1

        kern = functools.partial(_acm3d_fused_kernel, rows=bb, n_inv=1.0 / N)

        def wspec(shape):
            return pl.BlockSpec(shape, lambda g: (0, 0))

        y_flat = pl.pallas_call(
            kern,
            out_shape=jax.ShapeDtypeStruct((B, C, N), x.dtype),
            grid=(B // bb,),
            in_specs=[
                pl.BlockSpec((bb, C, N), lambda g: (g, 0, 0)),
                wspec((two_h, C)), wspec((C, two_h)),
                wspec((cmid, C)), wspec((cmid, 1)),
                wspec((C, cmid)), wspec((C, 1)),
            ],
            out_specs=pl.BlockSpec((bb, C, N), lambda g: (g, 0, 0)),
            compiler_params=pltpu.CompilerParams(
                dimension_semantics=("parallel",),
                vmem_limit_bytes=vmem_limit_bytes),
        )(x_flat, WKQ, Ssel, W1, b1v.reshape(cmid, 1), W2, b2v.reshape(C, 1))
        return y_flat.reshape(B, C, H, W, Z)

    # ---------------- two-pass fallback path ----------------
    # Tile sizing: target ~block_target_bytes per x-block, but budget the f32
    # temporaries of each pass against the scoped VMEM limit.
    per_lane1 = 2 * C * esize + 4 * C + 8 * two_h          # x(2x) + cast + logits + p
    per_lane2 = 4 * C * esize + 8 * C                      # x(2x) + y(2x) + casts
    per_lane = max(per_lane1, per_lane2)
    tn_cap = max(128, (work // per_lane) // 128 * 128)
    tn_tgt = max(128, (block_target_bytes // (4 * C)) // 128 * 128)
    tn = min(tn_tgt, tn_cap)
    if tile_n is not None:
        tn = max(128, (int(tile_n) // 128) * 128)
    elif N <= tn:
        tn = N                                             # full-extent block, no mask
    nt = pl.cdiv(N, tn)

    # Spatial split of the stats pass for megacore coverage when B == 1.
    nsplit = 2 if (B == 1 and nt >= 2) else 1
    tps = pl.cdiv(nt, nsplit)
    needs_mask = (nsplit * tps * tn != N)

    stats = functools.partial(_acm3d_stats_kernel, n_true=N, tile_n=tn,
                              tiles_per_split=tps, needs_mask=needs_mask)

    m_p, l_p, r_p, xs_p = pl.pallas_call(
        stats,
        out_shape=(jax.ShapeDtypeStruct((B, nsplit, two_h, 1), jnp.float32),
                   jax.ShapeDtypeStruct((B, nsplit, two_h, 1), jnp.float32),
                   jax.ShapeDtypeStruct((B, nsplit, C, two_h), jnp.float32),
                   jax.ShapeDtypeStruct((B, nsplit, C, 1), jnp.float32)),
        grid=(B, nsplit, tps),
        in_specs=[
            pl.BlockSpec((1, C, tn),
                         lambda b, s, n: (b, 0, jnp.minimum(s * tps + n, nt - 1))),
            pl.BlockSpec((two_h, C), lambda b, s, n: (0, 0)),
        ],
        out_specs=(pl.BlockSpec((1, 1, two_h, 1), lambda b, s, n: (b, s, 0, 0)),
                   pl.BlockSpec((1, 1, two_h, 1), lambda b, s, n: (b, s, 0, 0)),
                   pl.BlockSpec((1, 1, C, two_h), lambda b, s, n: (b, s, 0, 0)),
                   pl.BlockSpec((1, 1, C, 1), lambda b, s, n: (b, s, 0, 0))),
        scratch_shapes=[
            pltpu.VMEM((two_h, 1), jnp.float32),   # running max m
            pltpu.VMEM((two_h, 1), jnp.float32),   # running denom l
            pltpu.VMEM((C, two_h), jnp.float32),   # running numerator R
            pltpu.VMEM((C, 1), jnp.float32),       # running spatial sum
        ],
        compiler_params=pltpu.CompilerParams(
            dimension_semantics=("parallel", "parallel", "arbitrary"),
            vmem_limit_bytes=vmem_limit_bytes),
    )(x_flat, WKQ)

    # ---- tiny JAX epilogue on (B, C)-sized tensors: combine splits + finalize ----
    m_g = jnp.max(m_p, axis=1, keepdims=True)                 # (B, 1, 2H, 1)
    wgt = jnp.exp(m_p - m_g)                                  # (B, S, 2H, 1)
    l_g = jnp.sum(l_p * wgt, axis=1)                          # (B, 2H, 1)
    r_g = jnp.sum(r_p * jnp.swapaxes(wgt, 2, 3), axis=1)      # (B, C, 2H)
    xs_g = jnp.sum(xs_p, axis=1)                              # (B, C, 1)

    inv_l = 1.0 / l_g[:, :, 0]                                # (B, 2H)
    kq = jnp.einsum('bch,bh->bc', r_g * Ssel[None], inv_l)    # (B, C)  == K - Q
    mu = xs_g[:, :, 0] * (1.0 / N)                            # (B, C)
    h1 = jnp.maximum(mu @ W1.T + b1v[None, :], 0.0)           # (B, Cmid)
    pmod = jax.nn.sigmoid(h1 @ W2.T + b2v[None, :])           # (B, C)
    scale = pmod.reshape(B, C, 1).astype(jnp.float32)
    shift = (kq * pmod).reshape(B, C, 1).astype(jnp.float32)

    nt_apply = pl.cdiv(N, tn)
    y_flat = pl.pallas_call(
        _acm3d_apply_kernel,
        out_shape=jax.ShapeDtypeStruct((B, C, N), x.dtype),
        grid=(B, nt_apply),
        in_specs=[
            pl.BlockSpec((1, C, tn), lambda b, n: (b, 0, n)),
            pl.BlockSpec((1, C, 1), lambda b, n: (b, 0, 0)),
            pl.BlockSpec((1, C, 1), lambda b, n: (b, 0, 0)),
        ],
        out_specs=pl.BlockSpec((1, C, tn), lambda b, n: (b, 0, n)),
        compiler_params=pltpu.CompilerParams(
            dimension_semantics=("parallel", "parallel"),
            vmem_limit_bytes=vmem_limit_bytes),
    )(x_flat, scale, shift)

    return y_flat.reshape(B, C, H, W, Z)


# --------------------------------------------------------------------------
# Pure-JAX reference matching the PyTorch semantics exactly.
# --------------------------------------------------------------------------
def acm3d_ref(x, params, heads):
    B, C, H, W, Z = x.shape
    cph = C // heads
    cmid = C // 2
    cout1_g = cmid // heads
    N = H * W * Z
    mu = x.mean(axis=(2, 3, 4), keepdims=True)
    x_mu = x - mu

    def attend(w, b):
        xg = x_mu.reshape(B, heads, cph, N)
        logits = jnp.einsum('hc,bhcn->bhn', w, xg) + b[None, :, None]
        a = jax.nn.softmax(logits, axis=-1)
        res = jnp.einsum('bhcn,bhn->bhc', xg, a)
        return res.reshape(B, C, 1, 1, 1)

    K = attend(params["wk"], params["bk"])
    Q = attend(params["wq"], params["bq"])

    mu_g = mu.reshape(B, heads, cph)
    w1g = params["w1"].reshape(heads, cout1_g, cph)
    h1 = jnp.einsum('goc,bgc->bgo', w1g, mu_g) + params["b1"].reshape(heads, cout1_g)[None]
    h1 = jnp.maximum(h1, 0.0)
    w2g = params["w2"].reshape(heads, cph, cout1_g)
    h2 = jnp.einsum('goc,bgc->bgo', w2g, h1) + params["b2"].reshape(heads, cph)[None]
    P = jax.nn.sigmoid(h2).reshape(B, C, 1, 1, 1)
    return (x + K - Q) * P


if __name__ == "__main__":
    def make_params(key, C, heads):
        cph = C // heads
        cmid = C // 2
        cout1_g = cmid // heads
        ks = jax.random.split(key, 4)
        return dict(
            wk=jax.random.normal(ks[0], (heads, cph), jnp.float32) * (2.0 / heads) ** 0.5,
            bk=jnp.zeros((heads,), jnp.float32),
            wq=jax.random.normal(ks[1], (heads, cph), jnp.float32) * (2.0 / heads) ** 0.5,
            bq=jnp.zeros((heads,), jnp.float32),
            w1=jax.random.normal(ks[2], (cmid, cph), jnp.float32) * (2.0 / cmid) ** 0.5,
            b1=jnp.zeros((cmid,), jnp.float32),
            w2=jax.random.normal(ks[3], (C, cout1_g), jnp.float32) * (2.0 / C) ** 0.5,
            b2=jnp.zeros((C,), jnp.float32),
        )

    key = jax.random.PRNGKey(0)
    cases = [
        # (B, C, heads, (H, W, Z), kwargs)
        (2, 8, 4, (8, 8, 8), {}),                                       # fused, grid=(2,)
        (8, 8, 4, (4, 4, 4), {}),                                       # fused, batch-folded
        (1, 16, 4, (5, 5, 7), dict(force_two_pass=True, tile_n=128)),   # 2-pass, split + ragged
        (2, 8, 4, (8, 8, 8), dict(force_two_pass=True, tile_n=128)),    # 2-pass, multi-tile
    ]
    for idx, (B, C, heads, (H, W, Z), kw) in enumerate(cases):
        key, k1, k2 = jax.random.split(key, 3)
        x = jax.random.normal(k1, (B, C, H, W, Z), jnp.float32)
        params = make_params(k2, C, heads)

        y = acm3d_forward(x, params, heads, **kw)
        jax.block_until_ready(y)

        y_ref = acm3d_ref(x, params, heads)
        err = float(jnp.max(jnp.abs(y - y_ref)))
        assert jnp.allclose(y, y_ref, atol=1e-4, rtol=1e-4), \
            f"case {idx}: max abs err = {err}"

    print("KERNEL_OK")
</pallas_src>

<mosaic_0001>
module attributes {stable_mosaic.version = 11 : i64} {
  func.func @_acm3d_fused_kernel(%arg0: i32, %arg1: memref<1x8x512xf32, #tpu.memory_space<vmem>>, %arg2: memref<8x8xf32, #tpu.memory_space<vmem>>, %arg3: memref<8x8xf32, #tpu.memory_space<vmem>>, %arg4: memref<4x8xf32, #tpu.memory_space<vmem>>, %arg5: memref<4x1xf32, #tpu.memory_space<vmem>>, %arg6: memref<8x4xf32, #tpu.memory_space<vmem>>, %arg7: memref<8x1xf32, #tpu.memory_space<vmem>>, %arg8: memref<1x8x512xf32, #tpu.memory_space<vmem>>) attributes {dimension_semantics = [#tpu.dimension_semantics<parallel>], iteration_bounds = array<i64: 2>, scalar_prefetch = 0 : i64, scratch_operands = 0 : i64, tpu.core_type = #tpu.core_type<tc>, window_params = [{transform_indices = @transform_0, window_bounds = array<i64: 1, 8, 512>}, {pipeline_mode = #tpu.pipeline_mode<synchronous>, transform_indices = @transform_1, window_bounds = array<i64: 8, 8>}, {pipeline_mode = #tpu.pipeline_mode<synchronous>, transform_indices = @transform_2, window_bounds = array<i64: 8, 8>}, {pipeline_mode = #tpu.pipeline_mode<synchronous>, transform_indices = @transform_3, window_bounds = array<i64: 4, 8>}, {pipeline_mode = #tpu.pipeline_mode<synchronous>, transform_indices = @transform_4, window_bounds = array<i64: 4, 1>}, {pipeline_mode = #tpu.pipeline_mode<synchronous>, transform_indices = @transform_5, window_bounds = array<i64: 8, 4>}, {pipeline_mode = #tpu.pipeline_mode<synchronous>, transform_indices = @transform_6, window_bounds = array<i64: 8, 1>}, {transform_indices = @transform_7, window_bounds = array<i64: 1, 8, 512>}]} {
    %c0_i32 = arith.constant 0 : i32
    %c1_i32 = arith.constant 1 : i32
    %0 = arith.muli %c0_i32, %c1_i32 : i32
    %c0_i32_0 = arith.constant 0 : i32
    %1 = arith.addi %c0_i32_0, %0 : i32
    %2 = arith.index_cast %1 : i32 to index
    %c0 = arith.constant 0 : index
    %c0_1 = arith.constant 0 : index
    %3 = vector.load %arg1[%2, %c0, %c0_1] : memref<1x8x512xf32, #tpu.memory_space<vmem>>, vector<1x8x512xf32>
    %4 = vector.shape_cast %3 : vector<1x8x512xf32> to vector<8x512xf32>
    %c0_2 = arith.constant 0 : index
    %c0_3 = arith.constant 0 : index
    %5 = vector.load %arg2[%c0_2, %c0_3] : memref<8x8xf32, #tpu.memory_space<vmem>>, vector<8x8xf32>
    %cst = arith.constant dense<0.000000e+00> : vector<8x512xf32>
    %6 = tpu.matmul %5, %4, %cst {dimension_numbers = #tpu.dot_dimension_numbers<[1], [0], [0], [1], [0, 0, 1, 1], [], []>} : vector<8x8xf32>, vector<8x512xf32>, vector<8x512xf32> -> vector<8x512xf32>
    %cst_4 = arith.constant dense<0xFF800000> : vector<8xf32>
    %7 = vector.multi_reduction <maximumf>, %6, %cst_4 [1] : vector<8x512xf32> to vector<8xf32>
    %8 = vector.shape_cast %7 : vector<8xf32> to vector<8x1xf32>
    %9 = vector.broadcast %8 : vector<8x1xf32> to vector<8x512xf32>
    %10 = arith.subf %6, %9 : vector<8x512xf32>
    %11 = math.exp %10 : vector<8x512xf32>
    %cst_5 = arith.constant dense<0.000000e+00> : vector<8xf32>
    %12 = vector.multi_reduction <add>, %11, %cst_5 [1] : vector<8x512xf32> to vector<8xf32>
    %13 = vector.shape_cast %12 : vector<8xf32> to vector<8x1xf32>
    "tpu.trace_start"() <{level = 10 : i32, message = "cn,hn->ch"}> : () -> ()
    %cst_6 = arith.constant dense<0.000000e+00> : vector<8x8xf32>
    %14 = tpu.matmul %4, %11, %cst_6 {dimension_numbers = #tpu.dot_dimension_numbers<[1], [1], [0], [0], [0, 0, 1, 0], [], []>} : vector<8x512xf32>, vector<8x512xf32>, vector<8x8xf32> -> vector<8x8xf32>
    "tpu.trace_stop"() : () -> ()
    %15 = tpu.reciprocal %13 : vector<8x1xf32> -> vector<8x1xf32>
    %c0_7 = arith.constant 0 : index
    %c0_8 = arith.constant 0 : index
    %16 = vector.load %arg3[%c0_7, %c0_8] : memref<8x8xf32, #tpu.memory_space<vmem>>, vector<8x8xf32>
    %17 = arith.mulf %14, %16 : vector<8x8xf32>
    %cst_9 = arith.constant dense<0.000000e+00> : vector<8x1xf32>
    %18 = tpu.matmul %17, %15, %cst_9 {dimension_numbers = #tpu.dot_dimension_numbers<[1], [0], [0], [1], [0, 0, 1, 1], [], []>} : vector<8x8xf32>, vector<8x1xf32>, vector<8x1xf32> -> vector<8x1xf32>
    %cst_10 = arith.constant dense<0.000000e+00> : vector<8xf32>
    %19 = vector.multi_reduction <add>, %4, %cst_10 [1] : vector<8x512xf32> to vector<8xf32>
    %20 = vector.shape_cast %19 : vector<8xf32> to vector<8x1xf32>
    %cst_11 = arith.constant 0.001953125 : f32
    %21 = vector.broadcast %cst_11 : f32 to vector<8x1xf32>
    %22 = arith.mulf %20, %21 : vector<8x1xf32>
    %c0_12 = arith.constant 0 : index
    %c0_13 = arith.constant 0 : index
    %23 = vector.load %arg4[%c0_12, %c0_13] : memref<4x8xf32, #tpu.memory_space<vmem>>, vector<4x8xf32>
    %cst_14 = arith.constant dense<0.000000e+00> : vector<4x1xf32>
    %24 = tpu.matmul %23, %22, %cst_14 {dimension_numbers = #tpu.dot_dimension_numbers<[1], [0], [0], [1], [0, 0, 1, 1], [], []>} : vector<4x8xf32>, vector<8x1xf32>, vector<4x1xf32> -> vector<4x1xf32>
    %c0_15 = arith.constant 0 : index
    %c0_16 = arith.constant 0 : index
    %25 = vector.load %arg5[%c0_15, %c0_16] : memref<4x1xf32, #tpu.memory_space<vmem>>, vector<4x1xf32>
    %26 = arith.addf %24, %25 : vector<4x1xf32>
    %cst_17 = arith.constant 0.000000e+00 : f32
    %27 = vector.broadcast %cst_17 : f32 to vector<4x1xf32>
    %28 = arith.maximumf %26, %27 : vector<4x1xf32>
    %c0_18 = arith.constant 0 : index
    %c0_19 = arith.constant 0 : index
    %29 = vector.load %arg6[%c0_18, %c0_19] : memref<8x4xf32, #tpu.memory_space<vmem>>, vector<8x4xf32>
    %cst_20 = arith.constant dense<0.000000e+00> : vector<8x1xf32>
    %30 = tpu.matmul %29, %28, %cst_20 {dimension_numbers = #tpu.dot_dimension_numbers<[1], [0], [0], [1], [0, 0, 1, 1], [], []>} : vector<8x4xf32>, vector<4x1xf32>, vector<8x1xf32> -> vector<8x1xf32>
    %c0_21 = arith.constant 0 : index
    %c0_22 = arith.constant 0 : index
    %31 = vector.load %arg7[%c0_21, %c0_22] : memref<8x1xf32, #tpu.memory_space<vmem>>, vector<8x1xf32>
    %32 = arith.addf %30, %31 : vector<8x1xf32>
    %33 = arith.negf %32 : vector<8x1xf32>
    %34 = math.exp %33 : vector<8x1xf32>
    %cst_23 = arith.constant 1.000000e+00 : f32
    %35 = vector.broadcast %cst_23 : f32 to vector<8x1xf32>
    %36 = arith.addf %35, %34 : vector<8x1xf32>
    %37 = arith.divf %35, %36 : vector<8x1xf32>
    %38 = vector.broadcast %18 : vector<8x1xf32> to vector<8x512xf32>
    %39 = arith.addf %4, %38 : vector<8x512xf32>
    %40 = vector.broadcast %37 : vector<8x1xf32> to vector<8x512xf32>
    %41 = arith.mulf %39, %40 : vector<8x512xf32>
    %42 = arith.index_cast %1 : i32 to index
    %c0_24 = arith.constant 0 : index
    %c0_25 = arith.constant 0 : index
    %43 = vector.load %arg8[%42, %c0_24, %c0_25] : memref<1x8x512xf32, #tpu.memory_space<vmem>>, vector<1x8x512xf32>
    %44 = vector.shape_cast %43 : vector<1x8x512xf32> to vector<8x512xf32>
    %45 = vector.shape_cast %41 : vector<8x512xf32> to vector<1x8x512xf32>
    tpu.vector_store %arg8[%42, %c0_24, %c0_25], %45 {strides = array<i32>} : memref<1x8x512xf32, #tpu.memory_space<vmem>>, vector<1x8x512xf32>,
    %c1_i32_26 = arith.constant 1 : i32
    return
  }
  func.func @transform_0(%arg0: i32) -> (i32, i32, i32) {
    %c0_i32 = arith.constant 0 : i32
    %c0_i32_0 = arith.constant 0 : i32
    %c0_i32_1 = arith.constant 0 : i32
    return %arg0, %c0_i32, %c0_i32_0 : i32, i32, i32
  }
  func.func @transform_1(%arg0: i32) -> (i32, i32) {
    %c0_i32 = arith.constant 0 : i32
    %c0_i32_0 = arith.constant 0 : i32
    %c0_i32_1 = arith.constant 0 : i32
    return %c0_i32, %c0_i32_0 : i32, i32
  }
  func.func @transform_2(%arg0: i32) -> (i32, i32) {
    %c0_i32 = arith.constant 0 : i32
    %c0_i32_0 = arith.constant 0 : i32
    %c0_i32_1 = arith.constant 0 : i32
    return %c0_i32, %c0_i32_0 : i32, i32
  }
  func.func @transform_3(%arg0: i32) -> (i32, i32) {
    %c0_i32 = arith.constant 0 : i32
    %c0_i32_0 = arith.constant 0 : i32
    %c0_i32_1 = arith.constant 0 : i32
    return %c0_i32, %c0_i32_0 : i32, i32
  }
  func.func @transform_4(%arg0: i32) -> (i32, i32) {
    %c0_i32 = arith.constant 0 : i32
    %c0_i32_0 = arith.constant 0 : i32
    %c0_i32_1 = arith.constant 0 : i32
    return %c0_i32, %c0_i32_0 : i32, i32
  }
  func.func @transform_5(%arg0: i32) -> (i32, i32) {
    %c0_i32 = arith.constant 0 : i32
    %c0_i32_0 = arith.constant 0 : i32
    %c0_i32_1 = arith.constant 0 : i32
    return %c0_i32, %c0_i32_0 : i32, i32
  }
  func.func @transform_6(%arg0: i32) -> (i32, i32) {
    %c0_i32 = arith.constant 0 : i32
    %c0_i32_0 = arith.constant 0 : i32
    %c0_i32_1 = arith.constant 0 : i32
    return %c0_i32, %c0_i32_0 : i32, i32
  }
  func.func @transform_7(%arg0: i32) -> (i32, i32, i32) {
    %c0_i32 = arith.constant 0 : i32
    %c0_i32_0 = arith.constant 0 : i32
    %c0_i32_1 = arith.constant 0 : i32
    return %arg0, %c0_i32, %c0_i32_0 : i32, i32, i32
  }
}

</mosaic_0001>

<bundles_post_ra>
// kernel: tpu_custom_call.1
= control target key start
LH: loop header
LB: loop body
LE: loop exit
PB: predicated region body
PF: predicated region fallthrough
CT: control target
= control target key end

     0   :  { %12 = vsyncpa [#allocation3], 0  ;;  %s1421_s0 = inlined_call_operand.hbm [shape: f32[2,8,512], index: 0, kind: input, shape index: {}]   ;;  %s1422_s1 = inlined_call_operand.vmem [shape: f32[8,8], index: 1, kind: input, shape index: {}]   ;;  %s1423_s2 = inlined_call_operand.vmem [shape: f32[8,8], index: 2, kind: input, shape index: {}]   ;;  %s1424_s3 = inlined_call_operand.vmem [shape: f32[4,8], index: 3, kind: input, shape index: {}]   ;;  %s1425_s4 = inlined_call_operand.vmem [shape: f32[4,1], index: 4, kind: input, shape index: {}]   ;;  %s1426_s5 = inlined_call_operand.vmem [shape: f32[8,4], index: 5, kind: input, shape index: {}]   ;;  %s1427_s6 = inlined_call_operand.vmem [shape: f32[8,1], index: 6, kind: input, shape index: {}]   ;;  %s1428_s7 = inlined_call_operand.hbm [shape: f32[2,8,512], index: 7, kind: output, shape index: {}]  }
   0x1   :  { %14 = vsyncpa [#allocation3 + $0x1], 0 }
   0x2   :  { %15 = vsyncpa [#allocation4], 0 }
   0x3   :  { %17 = vsyncpa [#allocation4 + $0x1], 0  ;;  %s1207_s24 = smov 0   ;;  %s1209_s25 = smov 0  }
   0x4   :  { %s1211_s26 = smov 0   ;;  %s1213_s27 = smov 0  }
   0x5 LB: > { %s1228_s28 = sadd.s32 4294967295, %s1160_s27   ;;  %s959_s29 = sadd.s32 4294967294, %s1160_s27   ;;  %s1160_s27 = sphi %s1213_s27, %s1445_s27   ;;  %s1156_s26 = sphi %s1211_s26, %s1444_s26   ;;  %s1152_s25 = sphi %s1209_s25, %s1443_s25   ;;  %s1148_s24 = sphi %s1207_s24, %s1442_s24  }
   0x6   : > { %s1232_s30 = sadd.s32 1, %s1160_s27   ;;  %s30_s8 = sadd.s32 1, %s1156_s26 }
   0x7   : > { %s27_s9 = ssub.s32 %s1160_s27, %s1232_s30  ;;  %p37_p0 = scmp.ne.s32.totalorder %s1156_s26, %s1152_s25 }
   0x8   : > { %p28_p1 = scmp.eq.s32.totalorder %s27_s9, 0  ;;  %p38_p2 = scmp.eq.s32.totalorder %s1160_s27, 0 }
   0x9   : > { %p43_p3 = scmp.ne.s32.totalorder %s1152_s25, %s1148_s24  ;;  %p44_p4 = scmp.eq.s32.totalorder %s1228_s28, 0 }
   0xa   : > { %s1244_s10 = scalar_select %p28_p1, %s1156_s26, %s30_s8  }
   0xb   : > { %p1246_p5 = por %p38_p2, %p37_p0  ;;  %p1250_p6 = por %p44_p4, %p43_p3 }
   0xc   : > { %p193_p7 = scmp.eq.s32.totalorder %s1228_s28, 1  ;;  %p199_p8 = scmp.eq.s32.totalorder %s959_s29, 1 }
   0xd   : > { %s1432_s12 = scalar_select %p1250_p6, 1, 0 }
   0xe   : > { %p1015_p10 = scmp.lt.s32.totalorder %s1160_s27, 2  ;;  %p1257_p11 = por %p193_p7, %p37_p0 }
   0xf   : > { %p1261_p12 = por %p199_p8, %p43_p3  ;;  %s237_s15 = sand.u32 1, %s1156_s26  }
  0x10   : > { %s1433_s13 = scalar_select %p1257_p11, 1, 0 }
  0x11   : > { %s1434_s14 = scalar_select %p1261_p12, 1, 0 }
  0x12   : > { %s980_s16 = sshll.u32 %s1160_s27, 9  ;;  %s962_s17 = sshll.u32 %s237_s15, 5 }
  0x13   : > { %s1270_s20 = scalar_lea.hbm %s1421_s0, %s980_s16  ;;  %s241_s21 = scalar_lea.vmem [#allocation2], %s962_s17 }
  0x14   : > { %s249_s22 = sshll.u32 %s241_s21, 4  ;;  %p1274_p13 = pnand %p1015_p10, %p1246_p5  ;;  %s1278_s22 = int_to_ptr.vmem [resolvable:$true] %s249_s22 }
  0x15   : > { %s238_s29 = scalar_lea.sflag [#allocation3], %s237_s15  ;;  %s1068_s8 = scalar_lea.hbm %s1270_s20, 512 }
  0x16   : > { %p1069_p2 = scmp.ne.s32.totalorder %s1270_s20, %s1068_s8  ;;  %p1070_p3 = pneg %p1274_p13 }
  0x17   : > { %s1073_s11 = scalar_lea.hbm %s1421_s0, 1024  ;;  %p1074_p5 = scmp.lt.s32.totalorder %s1270_s20, %s1421_s0 }
  0x18   : > { %p1071_p4 = pnand %p1070_p3, %p1069_p2  ;;  %p1075_p8 = scmp.lt.s32.totalorder %s1073_s11, %s1068_s8 }
  0x1a   : > { %p1072_p7 = pneg %p1071_p4  ;;  %p1076_p10 = por %p1075_p8, %p1074_p5 }
  0x1c   : > { %p1077_p9 = pnand %p1076_p10, %p1072_p7 }
  0x1e   : > { %1080 = shalt.err (!%p1077_p9)
}
  0x1f   : > { %s1081_s15 = scalar_lea.vmem %s1278_s22, 512  ;;  %s1162_s19 = smov [#allocation2]  }
  0x20   : > { %p1082_p0 = scmp.ne.s32.totalorder %s1278_s22, %s1081_s15  ;;  %s1086_s21 = sshll.u32 %s1162_s19, 4  ;;  %s1087_s21 = int_to_ptr.vmem [resolvable:$false] %s1086_s21 }
  0x21   : > { %s1088_s9 = scalar_lea.vmem %s1087_s21, 1024  ;;  %p1089_p4 = scmp.lt.s32.totalorder %s1278_s22, %s1087_s21 }
  0x22   : > { %p1084_p1 = pnand %p1082_p0, %p1070_p3  ;;  %p1090_p12 = scmp.lt.s32.totalorder %s1088_s9, %s1081_s15 }
  0x24   : > { %p1085_p2 = pneg %p1084_p1  ;;  %p1091_p11 = por %p1090_p12, %p1089_p4 }
  0x26   : > { %p1092_p6 = pnand %p1091_p11, %p1085_p2 }
  0x28   : > { %1095 = shalt.err (!%p1092_p6)
}
  0x29   : > { %1010 = dma.hbm_to_vmem [thread:$0]  (!%p1274_p13), %s1270_s20, 512, %s1278_s22, %s238_s29  }
  0x2a   : > { %p1436_p9 = scmp.lt.s32.totalorder %s1160_s27, 3  ;;  %p1437_p7 = scmp.ge.s32.totalorder %s1160_s27, 1 }
  0x2c   : > { %p255_p0 = pnand %p1437_p7, %p1436_p9 }
  0x2d   : > { %s1305_s8 = sand.u32 (!%p255_p0), 1, %s1152_s25   ;;  %p1438_p6 = scmp.ne.s32.totalorder (!%p255_p0), %s1432_s12, 0 }
  0x2e   : > { %258 = sbr.rel (%p255_p0) target bundleno = 987 (0x3db), region = 48  ;;  %s966_s16 = sshll.u32 (!%p255_p0), %s1305_s8, 5 }
  0x2f   : > { %s261_s11 = scalar_lea.sflag (!%p255_p0), [#allocation3], %s1305_s8  ;;  %s264_s23 = scalar_lea.vmem (!%p255_p0), [#allocation2], %s966_s16 }
  0x33   : > { %1139 = dma.done.wait (%p1438_p6), %s261_s11, 512  }
  0x34   : > { %1141 = vsyncadd (%p1438_p6), %s261_s11, 4294966784  ;;  %v1163_v0 = vmov 0.0   ;;  %v1317_v1 = vld [vmem:[%s264_s23 + $0x8] sm:$0xff]  ;;  %v1319_v2 = vld [vmem:[%s264_s23 + $0x18] sm:$0xff]  ;;  %vm300_vm0 = vcmask 64512   ;;  %vm1164_vm1 = vmmov 0  }
  0x35   : > { %368 = vmatprep.mubr.f32.mxu0 %v1163_v0  ;;  %439 = vmatprep.mubr.f32.mxu1 %v1163_v0  ;;  %v1321_v3 = vld [vmem:[%s264_s23] sm:$0xff]  ;;  %v1325_v4 = vld [vmem:[%s264_s23 + $0x10] sm:$0xff]  ;;  %v1165_v35 = vmov 0   ;;  %vm772_vm2 = vcmask 1043456   ;;  %vm768_vm3 = vcmask 31744   ;;  %s981_s12 = sshll.u32 %s1228_s28, 9 }
  0x36   : > { %334 = vmatprep.subr.mxu0 %v1317_v1  ;;  %405 = vmatprep.subr.mxu1 %v1319_v2  ;;  %v299_v5 = vld [vmem:[%s1422_s1] sm:$0xff]  ;;  %v684_v6 = vadd.f32 %v1317_v1, %v1321_v3  ;;  %s294_s20 = scalar_lea.vmem [#allocation5], %s966_s16  ;;  %s1378_s16 = scalar_lea.hbm %s1428_s7, %s981_s12 }
  0x37   : > { %335 = vmatpush1.msra.mxu0 %v1321_v3  ;;  %406 = vmatpush1.msra.mxu1 %v1325_v4  ;;  %v690_v34 = vld [vmem:[%s1424_s3] sm:$0xf]  ;;  %s889_s22 = sshll.u32 %s294_s20, 4  ;;  %s875_s17 = scalar_lea.sflag [#allocation4], %s1305_s8  ;;  %s1380_s22 = int_to_ptr.vmem [resolvable:$true] %s889_s22 }
  0x38   : > { %968 = vmatmul.mubr.msk.f32.vlgmr.msra.gmra.mxu0 %vm300_vm0, %v299_v5  ;;  %969 = vmatmul.mubr.msk.f32.vlgmr.msra.gmra.mxu1 %vm300_vm0, %v299_v5  ;;  %v685_v13 = vadd.f32 %v684_v6, %v1325_v4  ;;  %v609_v40 = vld [vmem:[%s1423_s2] sm:$0xff]  ;;  %s1096_s18 = scalar_lea.vmem %s1380_s22, 512  ;;  %p1439_p12 = scmp.ne.s32.totalorder %s1433_s13, 0 }
  0x39   : > { %532 = vmatprep.mubr.f32.mxu0 %v1317_v1  ;;  %602 = vmatprep.mubr.f32.mxu1 %v1319_v2  ;;  %v691_v44 = vld [vmem:[%s1425_s4] sm:$0xf]  ;;  %p1097_p11 = scmp.ne.s32.totalorder %s1380_s22, %s1096_s18  ;;  %s1166_s15 = smov [#allocation5]  }
  0x3a   : > { %v686_v15 = vadd.f32 %v685_v13, %v1319_v2  ;;  %1052 = vset.pattern.permute.xlu1 %v1165_v35  ;;  %1053 = vset.pattern.permute.xlu0 %v1165_v35  ;;  %v766_v50 = vld [vmem:[%s1426_s5] sm:$0xff]  ;;  %s1100_s19 = sshll.u32 %s1166_s15, 4  ;;  %s1101_s19 = int_to_ptr.vmem [resolvable:$false] %s1100_s19 }
  0x3b   : > { %v767_v53 = vld [vmem:[%s1427_s6] sm:$0xff]  ;;  %p1098_p13 = pnand %p1097_p11, %p1439_p12  ;;  %s1102_s21 = scalar_lea.vmem %s1101_s19, 1024 }
  0x3c   : > { %p1103_p3 = scmp.lt.s32.totalorder %s1380_s22, %s1101_s19  ;;  %p1104_p5 = scmp.lt.s32.totalorder %s1102_s21, %s1096_s18 }
  0x3d   : > { %p1099_p1 = pneg %p1098_p13 }
  0x3e   : > { %p1105_p8 = por %p1104_p5, %p1103_p3 }
  0x40   : > { %p1106_p10 = pnand %p1105_p8, %p1099_p1 }
  0xf8   : > { %v370_v7 = vpop.f32.mrf.mxu0  ;;  %v441_v8 = vpop.f32.mrf.mxu1 }
  0xfa   : > { %v372_v9 = vpop.f32.mrf.mxu0  ;;  %v443_v10 = vpop.f32.mrf.mxu1 }
  0xfb   : > { %v446_v11 = vmax.f32 %v370_v7, %v372_v9  ;;  %v447_v12 = vmax.f32 %v441_v8, %v443_v10 }
  0xfd   : > { %v448_v14 = vmax.f32 %v446_v11, %v447_v12 }
  0xff   : > { %449 = vmax.xlane.f32.xlu0 %v448_v14 }
 0x103   : > { %687 = vadd.xlane.f32.xlu0 %v686_v15 }
 0x188   : > { %v450_v16 = vpop.xlane.xlu0 %449 }
 0x189   : > { %v451_v17 = vsub.f32 %v370_v7, %v450_v16  ;;  %v452_v18 = vsub.f32 %v372_v9, %v450_v16  ;;  %v453_v19 = vsub.f32 %v441_v8, %v450_v16  ;;  %v454_v20 = vsub.f32 %v443_v10, %v450_v16 }
 0x18b   : > { %v455_v21 = vmul.f32 1.442695, %v451_v17  ;;  %v457_v22 = vmul.f32 1.442695, %v452_v18  ;;  %v459_v23 = vmul.f32 1.442695, %v453_v19 }
 0x18c   : > { %v461_v24 = vmul.f32 1.442695, %v454_v20  ;;  %v688_v28 = vpop.xlane.xlu0 %687 }
 0x18d   : > { %1054 = vpow2.f32 %v455_v21  ;;  %v689_v32 = vmul.f32 0.001953125, %v688_v28 }
 0x18e   : > { %1056 = vpow2.f32 %v457_v22 }
 0x18f   : > { %1058 = vpow2.f32 %v459_v23 }
 0x190   : > { %1060 = vpow2.f32 %v461_v24 }
 0x19a   : > { %v1055_v25 = vpop.eup %1054 }
 0x19b   : > { %v1057_v26 = vpop.eup %1056 }
 0x19c   : > { %v1059_v27 = vpop.eup %1058  ;;  %498 = vmatprep.subr.mxu0 %v1057_v26  ;;  %v463_v29 = vadd.f32 %v1057_v26, %v1055_v25 }
 0x19d   : > { %v1061_v30 = vpop.eup %1060  ;;  %499 = vmatpush1.xpose.msra.mxu0 %v1055_v25 }
 0x19e   : > { %568 = vmatprep.subr.mxu1 %v1061_v30  ;;  %v464_v31 = vadd.f32 %v1059_v27, %v463_v29  ;;  %988 = vmatprep.subr.mxu0 %v1163_v0 }
 0x19f   : > { %569 = vmatpush1.xpose.msra.mxu1 %v1059_v27 }
 0x1a0   : > { %533 = vmatmul.mubr.f32.vlgmr.msra.gmra.mxu0 %v1321_v3  ;;  %993 = vmatprep.subr.mxu1 %v1163_v0  ;;  %v465_v33 = vadd.f32 %v1061_v30, %v464_v31 }
 0x1a1   : > { %990 = vmatprep.mubr.msk.f32.mxu0 %vm1164_vm1, %v1163_v0 }
 0x1a2   : > { %603 = vmatmul.mubr.f32.vlgmr.msra.gmra.mxu1 %v1325_v4  ;;  %466 = vadd.xlane.f32.xlu1 %v465_v33 }
 0x1a3   : > { %994 = vmatpush3.msra.mxu1 %v689_v32  ;;  %995 = vmatprep.mubr.msk.f32.mxu1 %vm1164_vm1, %v1163_v0 }
 0x1a6   : > { %996 = vmatmul.mubr.msk.f32.vlgmr.msra.gmra.mxu1 %vm300_vm0, %v690_v34 }
 0x22b   : > { %v467_v36 = vpop.xlane.xlu1 %466 }
 0x22c   : > { %1062 = vrcp.f32 %v467_v36 }
 0x239   : > { %v1063_v37 = vpop.eup %1062 }
 0x23a   : > { %989 = vmatpush3.msra.mxu0 %v1063_v37 }
 0x23b   : > { %998 = vmatprep.subr.mxu0 %v1163_v0 }
 0x260   : > { %v534_v38 = vpop.f32.mrf.mxu0 }
 0x262   : > { %v604_v39 = vpop.f32.mrf.mxu1  ;;  %v536_v41 = vpop.f32.mrf.mxu0 }
 0x263   : > { %v605_v42 = vadd.f32 %v604_v39, %v534_v38 }
 0x264   : > { %v606_v43 = vpop.f32.mrf.mxu1 }
 0x265   : > { %v610_v45 = vmul.f32 %v609_v40, %v605_v42 }
 0x266   : > { %v761_v46 = vpop.f32.mrf.mxu1 }
 0x267   : > { %v762_v47 = vadd.f32 %v761_v46, %v691_v44  ;;  %991 = vmatmul.mubr.msk.f32.vlgmr.msra.gmra.mxu0 %vm300_vm0, %v610_v45 }
 0x268   : > { %v997_v48 = vpop.f32.mrf.mxu1  ;;  %1000 = vmatprep.mubr.msk.f32.mxu0 %vm1164_vm1, %v1163_v0 }
 0x269   : > { %v765_v49 = vmax.f32 %v762_v47, 0.0 }
 0x26b   : > { %999 = vmatpush3.msk.msra.mxu0 %vm772_vm2, %v765_v49 }
 0x26c   : > { %1001 = vmatmul.mubr.msk.f32.vlgmr.msra.gmra.mxu0 %vm768_vm3, %v766_v50 }
 0x327   : > { %v680_v51 = vpop.f32.mrf.mxu0 }
 0x328   : > { %854 = vperm.xlu1 %1052, %v680_v51  }
 0x329   : > { %v992_v52 = vpop.f32.mrf.mxu0 }
 0x32c   : > { %v842_v54 = vpop.f32.mrf.mxu0 }
 0x32d   : > { %v843_v55 = vadd.f32 %v842_v54, %v767_v53 }
 0x32e   : > { %v1002_v56 = vpop.f32.mrf.mxu0 }
 0x32f   : > { %v974_v57 = vmul.f32 -1.442695, %v843_v55 }
 0x331   : > { %1064 = vpow2.f32 %v974_v57 }
 0x33e   : > { %v1065_v58 = vpop.eup %1064 }
 0x33f   : > { %v849_v59 = vadd.f32 1.0, %v1065_v58 }
 0x341   : > { %1066 = vrcp.f32 %v849_v59 }
 0x34e   : > { %v1067_v60 = vpop.eup %1066 }
 0x34f   : > { %863 = vperm.xlu0 %1053, %v1067_v60  }
 0x3a3   : > { %v855_v61 = vpop.permute.xlu1 %854 }
 0x3a4   : > { %v857_v62 = vadd.f32 %v855_v61, %v1321_v3  ;;  %v858_v63 = vadd.f32 %v855_v61, %v1317_v1  ;;  %v859_v0 = vadd.f32 %v855_v61, %v1325_v4  ;;  %v860_v5 = vadd.f32 %v855_v61, %v1319_v2 }
 0x3ca   : > { %v864_v6 = vpop.permute.xlu0 %863 }
 0x3cb   : > { %v866_v7 = vmul.f32 %v864_v6, %v857_v62  ;;  %v867_v8 = vmul.f32 %v864_v6, %v858_v63  ;;  %v868_v9 = vmul.f32 %v864_v6, %v859_v0  ;;  %v869_v10 = vmul.f32 %v864_v6, %v860_v5 }
 0x3cd   : > { %870 = vst [vmem:[%s294_s20] sm:$0xff] %v866_v7  ;;  %871 = vst [vmem:[%s294_s20 + $0x8] sm:$0xff] %v867_v8 }
 0x3ce   : > { %872 = vst [vmem:[%s294_s20 + $0x10] sm:$0xff] %v868_v9  ;;  %873 = vst [vmem:[%s294_s20 + $0x18] sm:$0xff] %v869_v10 }
 0x3cf   : > { %1109 = shalt.err (!%p1106_p10)
}
 0x3d0   : > { %s1110_s9 = scalar_lea.hbm %s1378_s16, 512  ;;  %s1114_s23 = scalar_lea.hbm %s1428_s7, 1024 }
 0x3d1   : > { %p1111_p2 = scmp.ne.s32.totalorder %s1378_s16, %s1110_s9  ;;  %p1115_p7 = scmp.lt.s32.totalorder %s1378_s16, %s1428_s7 }
 0x3d2   : > { %p1116_p0 = scmp.lt.s32.totalorder %s1114_s23, %s1110_s9 }
 0x3d3   : > { %p1112_p4 = pnand %p1111_p2, %p1439_p12 }
 0x3d4   : > { %p1117_p6 = por %p1116_p0, %p1115_p7 }
 0x3d5   : > { %p1113_p9 = pneg %p1112_p4 }
 0x3d7   : > { %p1118_p11 = pnand %p1117_p6, %p1113_p9 }
 0x3d9   : > { %1121 = shalt.err (!%p1118_p11)
}
 0x3da   : > { %1005 = dma.vmem_to_hbm [thread:$0]  (%p1439_p12), %s1380_s22, 512, %s1378_s16, %s875_s17  }
 0x3db PF: > { %s901_s29 = sand.u32 1, %s1148_s24   ;;  %p1440_p13 = scmp.ne.s32.totalorder %s1434_s14, 0 }
 0x3dc   : > { %p1441_p1 = scmp.ge.s32.totalorder %s1160_s27, 2  ;;  %s902_s28 = scalar_lea.sflag [#allocation4], %s901_s29 }
 0x3de   : > { %p1012_p3 = pnand %p1441_p1, %p1440_p13 }
 0x3e0   : > { %p1013_p5 = pneg %p1012_p3 }
 0x3e2   : > { %1143 = dma.done.wait (%p1013_p5), %s902_s28, 512  }
 0x3e3   : > { %1145 = vsyncadd (%p1013_p5), %s902_s28, 4294966784  ;;  %p20_p8 = scmp.ge.s32.totalorder %s1232_s30, 4   ;;  %s1442_s24 = smov %s1152_s25 }
 0x3e4   : > { %s1443_s25 = smov %s1156_s26  ;;  %s1444_s26 = smov %s1244_s10 }
 0x3e5   : > { %s1445_s27 = smov %s1232_s30  ;;  %22 = sbr.rel (!%p20_p8) target bundleno = 5 (0x5), region = 93 }
 0x3ea   :  { %907 = vsyncpa [#allocation3], 1 }
 0x3eb   :  { %909 = vsyncpa [#allocation3 + $0x1], 1 }
 0x3ec   :  { %910 = vsyncpa [#allocation4], 1 }
 0x3ed   :  { %912 = vsyncpa [#allocation4 + $0x1], 1 }

</bundles_post_ra>
